<compile_context>
chip_gen: v7x
topology: tpu7x:2x2x1
jax: 0.10.0
libtpu: 0.0.40
codegen_flags: <defaults>
</compile_context>

<pallas_src>
import functools
import numpy as np

import jax
import jax.numpy as jnp
from jax.experimental import pallas as pl
from jax.experimental.pallas import tpu as pltpu


# MXU operand dtype: bf16 halves operand bytes and doubles MXU rate on v6e/v7x.
# All accumulation / LayerNorm / softmax / BatchNorm arithmetic stays in f32
# (v5e has no bf16 VPU/EUP path).  Set to jnp.float32 for bit-closer parity.
_MM_DTYPE = jnp.bfloat16

_CPARAMS = pltpu.CompilerParams(
    dimension_semantics=("parallel",),
    vmem_limit_bytes=32 * 1024 * 1024,
)


def _round_up(x, m):
    return (x + m - 1) // m * m


def _pick_tm(m, cap=128):
    """Row-tile size: multiple of 8, <= cap, aiming for >=4 grid steps
    (keeps both v7x TensorCores busy) without padding the array."""
    tm = max(32, -(-m // 4))
    tm = min(tm, cap, _round_up(m, 8))
    return _round_up(tm, 8)


# ----------------------------------------------------------------------------
# Pallas kernels
# ----------------------------------------------------------------------------
def _apply_act(y, activation):
    if activation is None:
        return y
    if activation == "gelu":
        # TODO(synk): torch nn.GELU() is exact-erf; tanh approximation is used here
        # so the activation can be fused into the matmul epilogue (Mosaic-safe).
        return jax.nn.gelu(y, approximate=True)
    if activation == "relu":
        return jnp.maximum(y, 0.0)
    raise ValueError(activation)


def _linear_kernel(*refs, activation, has_residual):
    if has_residual:
        x_ref, w_ref, b_ref, r_ref, o_ref = refs
    else:
        x_ref, w_ref, b_ref, o_ref = refs
        r_ref = None
    y = jnp.dot(x_ref[...].astype(_MM_DTYPE), w_ref[...].astype(_MM_DTYPE),
                preferred_element_type=jnp.float32) + b_ref[...]
    y = _apply_act(y, activation)
    if r_ref is not None:
        y = y + r_ref[...]
    o_ref[...] = y


def _ln_linear_kernel(x_ref, g_ref, bt_ref, w_ref, b_ref, o_ref, *, activation):
    x = x_ref[...]
    mu = jnp.mean(x, axis=-1, keepdims=True)
    var = jnp.mean(jnp.square(x - mu), axis=-1, keepdims=True)
    xn = (x - mu) * jax.lax.rsqrt(var + 1e-5) * g_ref[...] + bt_ref[...]
    y = jnp.dot(xn.astype(_MM_DTYPE), w_ref[...].astype(_MM_DTYPE),
                preferred_element_type=jnp.float32) + b_ref[...]
    o_ref[...] = _apply_act(y, activation)


def _layernorm_kernel(x_ref, g_ref, b_ref, o_ref):
    x = x_ref[...]
    mu = jnp.mean(x, axis=-1, keepdims=True)
    var = jnp.mean(jnp.square(x - mu), axis=-1, keepdims=True)
    o_ref[...] = (x - mu) * jax.lax.rsqrt(var + 1e-5) * g_ref[...] + b_ref[...]


def _attn_kernel(q_ref, k_ref, v_ref, o_ref, *, scale):
    q = q_ref[...].astype(_MM_DTYPE)
    k = k_ref[...].astype(_MM_DTYPE)
    # Batched over heads; contraction on the last dims (no explicit K transpose).
    s = jnp.einsum("bqd,bkd->bqk", q, k,
                   preferred_element_type=jnp.float32) * scale
    s = s - jnp.max(s, axis=-1, keepdims=True)
    p = jnp.exp(s)
    p = p / jnp.sum(p, axis=-1, keepdims=True)
    o_ref[...] = jnp.einsum("bqk,bkd->bqd", p.astype(_MM_DTYPE),
                            v_ref[...].astype(_MM_DTYPE),
                            preferred_element_type=jnp.float32)


def _proj_bn_relu_kernel(x_ref, w_ref, b_ref, o_ref, *, nb):
    """One frame-channel of the projector: Linear -> BatchNorm2d(train) -> ReLU.
    BN statistics are computed over all (batch, patch, feature) elements of this
    channel, exactly as BatchNorm2d(num_frames) does."""
    w = w_ref[...].astype(_MM_DTYPE)
    b = b_ref[...]
    ys = []
    for bi in range(nb):                                   # nb is static & tiny
        ys.append(jnp.dot(x_ref[bi].astype(_MM_DTYPE), w,
                          preferred_element_type=jnp.float32) + b)
    cnt = float(nb * ys[0].shape[0] * ys[0].shape[1])
    mu = sum([jnp.sum(y) for y in ys]) / cnt
    var = sum([jnp.sum(jnp.square(y - mu)) for y in ys]) / cnt
    inv = jax.lax.rsqrt(var + 1e-5)
    for bi in range(nb):
        o_ref[bi] = jnp.maximum((ys[bi] - mu) * inv, 0.0)


# ----------------------------------------------------------------------------
# Pallas wrappers
# ----------------------------------------------------------------------------
def pallas_linear(x, w, b=None, activation=None, residual=None):
    """(M, K) @ (K, N) + b [+ activation] [+ residual]; f32 accumulation."""
    M, K = x.shape
    N = w.shape[1]
    if b is None:
        b = jnp.zeros((N,), jnp.float32)
    TM = _pick_tm(M)
    in_specs = [
        pl.BlockSpec((TM, K), lambda i: (i, 0)),
        pl.BlockSpec((K, N), lambda i: (0, 0)),
        pl.BlockSpec((1, N), lambda i: (0, 0)),
    ]
    args = [x.astype(jnp.float32), w.astype(jnp.float32),
            b.reshape(1, N).astype(jnp.float32)]
    if residual is not None:
        in_specs.append(pl.BlockSpec((TM, N), lambda i: (i, 0)))
        args.append(residual.reshape(M, N).astype(jnp.float32))
    return pl.pallas_call(
        functools.partial(_linear_kernel, activation=activation,
                          has_residual=residual is not None),
        out_shape=jax.ShapeDtypeStruct((M, N), jnp.float32),
        grid=(pl.cdiv(M, TM),),
        in_specs=in_specs,
        out_specs=pl.BlockSpec((TM, N), lambda i: (i, 0)),
        compiler_params=_CPARAMS,
    )(*args)


def pallas_ln_linear(x, gamma, beta, w, b=None, activation=None):
    """Fused LayerNorm(last axis) -> Linear [-> activation]; x: (M, K)."""
    M, K = x.shape
    N = w.shape[1]
    if b is None:
        b = jnp.zeros((N,), jnp.float32)
    TM = _pick_tm(M)
    return pl.pallas_call(
        functools.partial(_ln_linear_kernel, activation=activation),
        out_shape=jax.ShapeDtypeStruct((M, N), jnp.float32),
        grid=(pl.cdiv(M, TM),),
        in_specs=[
            pl.BlockSpec((TM, K), lambda i: (i, 0)),
            pl.BlockSpec((1, K), lambda i: (0, 0)),
            pl.BlockSpec((1, K), lambda i: (0, 0)),
            pl.BlockSpec((K, N), lambda i: (0, 0)),
            pl.BlockSpec((1, N), lambda i: (0, 0)),
        ],
        out_specs=pl.BlockSpec((TM, N), lambda i: (i, 0)),
        compiler_params=_CPARAMS,
    )(x.astype(jnp.float32), gamma.reshape(1, K).astype(jnp.float32),
      beta.reshape(1, K).astype(jnp.float32), w.astype(jnp.float32),
      b.reshape(1, N).astype(jnp.float32))


def pallas_layernorm(x, gamma, beta):
    """LayerNorm over the last axis, any leading shape."""
    orig_shape = x.shape
    D = orig_shape[-1]
    x2 = x.reshape(-1, D).astype(jnp.float32)
    M = x2.shape[0]
    TM = _pick_tm(M)
    out = pl.pallas_call(
        _layernorm_kernel,
        out_shape=jax.ShapeDtypeStruct((M, D), jnp.float32),
        grid=(pl.cdiv(M, TM),),
        in_specs=[
            pl.BlockSpec((TM, D), lambda i: (i, 0)),
            pl.BlockSpec((1, D), lambda i: (0, 0)),
            pl.BlockSpec((1, D), lambda i: (0, 0)),
        ],
        out_specs=pl.BlockSpec((TM, D), lambda i: (i, 0)),
        compiler_params=_CPARAMS,
    )(x2, gamma.reshape(1, D).astype(jnp.float32),
      beta.reshape(1, D).astype(jnp.float32))
    return out.reshape(orig_shape)


def pallas_attention_core(q, k, v, scale):
    """q,k,v: (B*H, S, Dh) -> softmax(q k^T * scale) v, heads batched per grid step."""
    BH, S, Dh = q.shape
    bh_tile = min(BH, 64)
    return pl.pallas_call(
        functools.partial(_attn_kernel, scale=scale),
        out_shape=jax.ShapeDtypeStruct((BH, S, Dh), jnp.float32),
        grid=(pl.cdiv(BH, bh_tile),),
        in_specs=[pl.BlockSpec((bh_tile, S, Dh), lambda i: (i, 0, 0))] * 3,
        out_specs=pl.BlockSpec((bh_tile, S, Dh), lambda i: (i, 0, 0)),
        compiler_params=_CPARAMS,
    )(q.astype(jnp.float32), k.astype(jnp.float32), v.astype(jnp.float32))


def pallas_linear_bn_relu(x, w, b):
    """Projector layer: Linear over the last dim + train-mode BatchNorm2d over the
    frame channel (axis 1) + ReLU, fused.  x: (B, T', N, Din) -> (B, T', N, K)."""
    B_, T_, N_, Din = x.shape
    K = w.shape[1]
    return pl.pallas_call(
        functools.partial(_proj_bn_relu_kernel, nb=B_),
        out_shape=jax.ShapeDtypeStruct((B_, T_, N_, K), jnp.float32),
        grid=(T_,),
        in_specs=[
            pl.BlockSpec((B_, None, N_, Din), lambda t: (0, t, 0, 0)),
            pl.BlockSpec((Din, K), lambda t: (0, 0)),
            pl.BlockSpec((1, K), lambda t: (0, 0)),
        ],
        out_specs=pl.BlockSpec((B_, None, N_, K), lambda t: (0, t, 0, 0)),
        compiler_params=_CPARAMS,
    )(x.astype(jnp.float32), w.astype(jnp.float32),
      b.reshape(1, K).astype(jnp.float32))


# ----------------------------------------------------------------------------
# Model forward (glue: reshapes / parameter plumbing)
# ----------------------------------------------------------------------------
def attention_fwd(x, p, num_heads, ln=None, add_residual=False):
    """Attention(LN(x)) [+ x if add_residual].  LN is fused into the qkv matmul;
    the residual add (if any) is fused into the proj matmul epilogue."""
    B_, N_, C = x.shape
    head_dim = C // num_heads
    scale = head_dim ** (-0.5)
    x2 = x.reshape(-1, C)
    if ln is not None:
        qkv = pallas_ln_linear(x2, ln["g"], ln["b"], p["qkv"]["w"], p["qkv"]["b"])
    else:
        qkv = pallas_linear(x2, p["qkv"]["w"], p["qkv"]["b"])
    qkv = qkv.reshape(B_, N_, 3, num_heads, head_dim)
    qkv = jnp.transpose(qkv, (2, 0, 3, 1, 4))           # (3, B, H, N, Dh)
    q, k, v = qkv[0], qkv[1], qkv[2]
    q = q.reshape(B_ * num_heads, N_, head_dim)
    k = k.reshape(B_ * num_heads, N_, head_dim)
    v = v.reshape(B_ * num_heads, N_, head_dim)
    o = pallas_attention_core(q, k, v, scale)
    o = o.reshape(B_, num_heads, N_, head_dim).transpose(0, 2, 1, 3).reshape(-1, C)
    res = x2 if add_residual else None
    o = pallas_linear(o, p["proj"]["w"], p["proj"]["b"], residual=res)
    return o.reshape(B_, N_, C)


def block_fwd(x, p, B, T, W, num_heads):
    """divided_space_time block; drop_path == identity."""
    L, D = x.shape[1], x.shape[2]
    h = L // (W * T)

    # temporal attention: 'b (h w t) m -> (b h w) t m'
    xt_in = x.reshape(B * h * W, T, D)
    res_t = attention_fwd(xt_in, p["temporal_attn"], num_heads,
                          ln=p["temporal_norm1"])
    res_t = res_t.reshape(B * L, D)
    # xt = x + temporal_fc(res_t)   (residual fused into the matmul epilogue)
    xt = pallas_linear(res_t, p["temporal_fc"]["w"], p["temporal_fc"]["b"],
                       residual=x.reshape(B * L, D)).reshape(B, L, D)

    # spatial attention: 'b (h w t) m -> (b t) (h w) m'   (residual fused in-kernel)
    xs = xt.reshape(B, h, W, T, D).transpose(0, 3, 1, 2, 4).reshape(B * T, h * W, D)
    xs = attention_fwd(xs, p["attn"], num_heads, ln=p["norm1"], add_residual=True)
    x = xs.reshape(B, T, h, W, D).transpose(0, 2, 3, 1, 4).reshape(B, L, D)

    # MLP: LN -> fc1 -> GELU fused in one kernel; fc2 + residual fused in another.
    h1 = pallas_ln_linear(x.reshape(B * L, D), p["norm2"]["g"], p["norm2"]["b"],
                          p["mlp"]["fc1"]["w"], p["mlp"]["fc1"]["b"],
                          activation="gelu")
    x = pallas_linear(h1, p["mlp"]["fc2"]["w"], p["mlp"]["fc2"]["b"],
                      residual=x.reshape(B * L, D)).reshape(B, L, D)
    return x


def vit_fwd(x, p, B, T, W, num_heads):
    for bp in p["blocks"]:
        x = block_fwd(x, bp, B, T, W, num_heads)
    return pallas_layernorm(x, p["norm"]["g"], p["norm"]["b"])


def projector_fwd(x, p):
    """x: (B, T', N, D). [Linear -> BatchNorm2d(T') -> ReLU]* -> Linear (no bias)."""
    h = x
    for layer in p["layers"]:
        h = pallas_linear_bn_relu(h, layer["w"], layer["b"])
    sh = h.shape
    out = pallas_linear(h.reshape(-1, sh[-1]), p["final"]["w"], None)
    return out.reshape(sh[:-1] + (p["final"]["w"].shape[1],))


def patch_embed_fwd(x, p, patch_size):
    """x: (B, C, T, H, W) -> ((B*T, num_patches, D), T, W_patches)."""
    B, C, T, H, W = x.shape
    pch = patch_size
    x = jnp.transpose(x, (0, 2, 1, 3, 4)).reshape(B * T, C, H, W)
    gh, gw = H // pch, W // pch
    patches = (
        x.reshape(B * T, C, gh, pch, gw, pch)
        .transpose(0, 2, 4, 1, 3, 5)
        .reshape(B * T * gh * gw, C * pch * pch)
    )
    emb = pallas_linear(patches, p["w"], p["b"])
    D = p["w"].shape[1]
    return emb.reshape(B * T, gh * gw, D), T, gw


def get_patch_embeddings(x, params):
    B = x.shape[0]
    xe, T, W = patch_embed_fwd(x, params["patch_embed"], params["patch_size"])
    xe = xe + params["pos_embed"]                       # (1, N, D)
    Bt, N, D = xe.shape
    # '(b t) n m -> (b n) t m'
    xe = xe.reshape(B, T, N, D).transpose(0, 2, 1, 3).reshape(B * N, T, D)
    xe = xe + params["time_embed"]                      # T == num_frames here
    # '(b n) t m -> b (n t) m'
    xe = xe.reshape(B, N * T, D)
    return xe, B, T, W


def ijepa_forward(params, x, mask_indices):
    xe, B, T, W = get_patch_embeddings(x, params)
    D = params["embed_dim"]
    M = params["M"]
    num_heads = params["num_heads"]
    N = xe.shape[1] // T

    # ---- target blocks (teacher, no-grad path) ----
    enc = vit_fwd(xe, params["teacher_encoder"], B, T, W, num_heads)
    enc = enc.reshape(B, T, N, D)
    tgt = projector_fwd(enc, params["teacher_projector"])
    tgt = pallas_layernorm(tgt, params["norm"]["g"], params["norm"]["b"])
    target_blocks = tgt[:, np.asarray(mask_indices)]     # (B, M, N, D)

    # ---- context block ----
    xg = xe.reshape(B, T, N, D)
    keep = np.ones(T, dtype=bool)
    keep[np.asarray(mask_indices)] = False
    keep_idx = np.where(keep)[0]
    context = xg[:, keep_idx].reshape(B, (T - M) * N, D)

    # ---- student encoding ----
    cenc = vit_fwd(context, params["student_encoder"], B, T - M, W, num_heads)
    cenc = cenc.reshape(B, T - M, N, D)
    cenc = projector_fwd(cenc, params["student_projector"])
    cenc = pallas_layernorm(cenc, params["norm"]["g"], params["norm"]["b"])
    context_encoding = cenc.reshape(B, (T - M) * N, D)

    # ---- target mask tokens ----
    n = target_blocks.shape[2]
    target_masks = jnp.broadcast_to(params["mask_token"].reshape(1, 1, 1, D), (B, M, n, D))
    target_masks = target_masks + params["pos_embed"][:, None]                       # (1,1,N,D)
    target_masks = target_masks + params["time_embed"][:, np.asarray(mask_indices)][:, :, None, :]
    target_masks = target_masks.reshape(B, M * n, D)

    # ---- predictor ----
    pred_in = jnp.concatenate([context_encoding, target_masks], axis=1)
    pred = vit_fwd(pred_in, params["predictor"], B, T, W, num_heads)
    prediction_blocks = pred[:, -M:]
    return prediction_blocks, target_blocks


# ----------------------------------------------------------------------------
# Deterministic parameter initialization (shapes follow the module __init__)
# ----------------------------------------------------------------------------
def init_linear(key, in_dim, out_dim, bias=True, std=0.02):
    w = jax.random.normal(key, (in_dim, out_dim), jnp.float32) * std
    b = jnp.zeros((out_dim,), jnp.float32) if bias else None
    return {"w": w, "b": b}


def init_block(key, dim, num_heads, mlp_ratio, qkv_bias):
    ks = jax.random.split(key, 7)
    hidden = int(dim * mlp_ratio)
    def ln():
        return {"g": jnp.ones((dim,), jnp.float32), "b": jnp.zeros((dim,), jnp.float32)}
    return {
        "norm1": ln(),
        "attn": {"qkv": init_linear(ks[0], dim, 3 * dim, bias=qkv_bias),
                 "proj": init_linear(ks[1], dim, dim)},
        "temporal_norm1": ln(),
        "temporal_attn": {"qkv": init_linear(ks[2], dim, 3 * dim, bias=qkv_bias),
                          "proj": init_linear(ks[3], dim, dim)},
        "temporal_fc": init_linear(ks[4], dim, dim),
        "norm2": ln(),
        "mlp": {"fc1": init_linear(ks[5], dim, hidden),
                "fc2": init_linear(ks[6], hidden, dim)},
    }


def init_vit(key, dim, depth, num_heads, mlp_ratio, qkv_bias):
    ks = jax.random.split(key, depth)
    blocks = [init_block(ks[i], dim, num_heads, mlp_ratio, qkv_bias) for i in range(depth)]
    return {"blocks": blocks,
            "norm": {"g": jnp.ones((dim,), jnp.float32), "b": jnp.zeros((dim,), jnp.float32)}}


def init_projector(key, dim, sizes):
    ks = jax.random.split(key, len(sizes) + 1)
    layers, prev = [], dim
    for i, s in enumerate(sizes):
        lin = init_linear(ks[i], prev, s)
        layers.append(lin)
        prev = s
    final = init_linear(ks[-1], prev, dim, bias=False)
    return {"layers": layers, "final": {"w": final["w"]}}


# ----------------------------------------------------------------------------
if __name__ == "__main__":
    key = jax.random.PRNGKey(0)

    # small config (num_frames=22 and mask indices in [11, 21] are hard-coded in the reference)
    img_size, patch_size, in_chans = 16, 8, 3
    num_frames, M = 22, 4
    embed_dim, num_heads = 32, 4
    enc_depth = pred_depth = 2
    mlp_ratio = 4.0
    sizes = [48, 64]
    B = 2
    num_patches = (img_size // patch_size) ** 2

    keys = jax.random.split(key, 12)
    teacher = init_vit(keys[0], embed_dim, enc_depth, num_heads, mlp_ratio, False)
    student = jax.tree_util.tree_map(lambda a: a, teacher)   # deepcopy semantics
    predictor = init_vit(keys[1], embed_dim, pred_depth, num_heads, mlp_ratio, False)

    params = {
        "patch_size": patch_size,
        "embed_dim": embed_dim,
        "num_heads": num_heads,
        "M": M,
        "mask_token": jax.random.normal(keys[2], (1, 1, embed_dim), jnp.float32) * 0.02,
        "pos_embed": jax.random.normal(keys[3], (1, num_patches, embed_dim), jnp.float32) * 0.02,
        "time_embed": jax.random.normal(keys[4], (1, num_frames, embed_dim), jnp.float32) * 0.02,
        "patch_embed": {
            "w": jax.random.normal(keys[5], (in_chans * patch_size * patch_size, embed_dim),
                                   jnp.float32) * 0.02,
            "b": jnp.zeros((embed_dim,), jnp.float32),
        },
        "norm": {"g": jnp.ones((embed_dim,), jnp.float32), "b": jnp.zeros((embed_dim,), jnp.float32)},
        "teacher_encoder": teacher,
        "student_encoder": student,
        "predictor": predictor,
        "teacher_projector": init_projector(keys[6], embed_dim, sizes),
        "student_projector": init_projector(keys[7], embed_dim, sizes),
    }

    x = jax.random.normal(keys[8], (B, in_chans, num_frames, img_size, img_size), jnp.float32)
    mask_indices = np.asarray(jax.random.permutation(keys[9], 11)[:M]) + 11

    pred_blocks, tgt_blocks = ijepa_forward(params, x, mask_indices)
    jax.block_until_ready((pred_blocks, tgt_blocks))

    assert pred_blocks.shape == (B, M, embed_dim), pred_blocks.shape
    assert tgt_blocks.shape == (B, M, num_patches, embed_dim), tgt_blocks.shape
    assert bool(jnp.all(jnp.isfinite(pred_blocks))) and bool(jnp.all(jnp.isfinite(tgt_blocks)))
    print("KERNEL_OK")
</pallas_src>

<mosaic_0001>
module attributes {stable_mosaic.version = 11 : i64} {
  func.func @_linear_kernel(%arg0: i32, %arg1: memref<48x192xf32, #tpu.memory_space<vmem>>, %arg2: memref<192x32xf32, #tpu.memory_space<vmem>>, %arg3: memref<1x32xf32, #tpu.memory_space<vmem>>, %arg4: memref<48x32xf32, #tpu.memory_space<vmem>>) attributes {dimension_semantics = [#tpu.dimension_semantics<parallel>], iteration_bounds = array<i64: 4>, scalar_prefetch = 0 : i64, scratch_operands = 0 : i64, tpu.core_type = #tpu.core_type<tc>, window_params = [{transform_indices = @transform_0, window_bounds = array<i64: 48, 192>}, {pipeline_mode = #tpu.pipeline_mode<synchronous>, transform_indices = @transform_1, window_bounds = array<i64: 192, 32>}, {pipeline_mode = #tpu.pipeline_mode<synchronous>, transform_indices = @transform_2, window_bounds = array<i64: 1, 32>}, {transform_indices = @transform_3, window_bounds = array<i64: 48, 32>}]} {
    %c0 = arith.constant 0 : index
    %c0_0 = arith.constant 0 : index
    %0 = vector.load %arg1[%c0, %c0_0] : memref<48x192xf32, #tpu.memory_space<vmem>>, vector<48x192xf32>
    %1 = arith.truncf %0 : vector<48x192xf32> to vector<48x192xbf16>
    %c0_1 = arith.constant 0 : index
    %c0_2 = arith.constant 0 : index
    %2 = vector.load %arg2[%c0_1, %c0_2] : memref<192x32xf32, #tpu.memory_space<vmem>>, vector<192x32xf32>
    %3 = arith.truncf %2 : vector<192x32xf32> to vector<192x32xbf16>
    %cst = arith.constant dense<0.000000e+00> : vector<48x32xf32>
    %4 = tpu.matmul %1, %3, %cst {dimension_numbers = #tpu.dot_dimension_numbers<[1], [0], [0], [1], [0, 0, 1, 1], [], []>} : vector<48x192xbf16>, vector<192x32xbf16>, vector<48x32xf32> -> vector<48x32xf32>
    %c0_3 = arith.constant 0 : index
    %c0_4 = arith.constant 0 : index
    %5 = vector.load %arg3[%c0_3, %c0_4] : memref<1x32xf32, #tpu.memory_space<vmem>>, vector<1x32xf32>
    %6 = vector.broadcast %5 : vector<1x32xf32> to vector<48x32xf32>
    %7 = arith.addf %4, %6 : vector<48x32xf32>
    %c0_5 = arith.constant 0 : index
    %c0_6 = arith.constant 0 : index
    %8 = vector.load %arg4[%c0_5, %c0_6] : memref<48x32xf32, #tpu.memory_space<vmem>>, vector<48x32xf32>
    tpu.vector_store %arg4[%c0_5, %c0_6], %7 {strides = array<i32>} : memref<48x32xf32, #tpu.memory_space<vmem>>, vector<48x32xf32>,
    return
  }
  func.func @transform_0(%arg0: i32) -> (i32, i32) {
    %c0_i32 = arith.constant 0 : i32
    %c0_i32_0 = arith.constant 0 : i32
    return %arg0, %c0_i32 : i32, i32
  }
  func.func @transform_1(%arg0: i32) -> (i32, i32) {
    %c0_i32 = arith.constant 0 : i32
    %c0_i32_0 = arith.constant 0 : i32
    %c0_i32_1 = arith.constant 0 : i32
    return %c0_i32, %c0_i32_0 : i32, i32
  }
  func.func @transform_2(%arg0: i32) -> (i32, i32) {
    %c0_i32 = arith.constant 0 : i32
    %c0_i32_0 = arith.constant 0 : i32
    %c0_i32_1 = arith.constant 0 : i32
    return %c0_i32, %c0_i32_0 : i32, i32
  }
  func.func @transform_3(%arg0: i32) -> (i32, i32) {
    %c0_i32 = arith.constant 0 : i32
    %c0_i32_0 = arith.constant 0 : i32
    return %arg0, %c0_i32 : i32, i32
  }
}

</mosaic_0001>

<bundles_post_ra>
// kernel: tpu_custom_call.1
= control target key start
LH: loop header
LB: loop body
LE: loop exit
PB: predicated region body
PF: predicated region fallthrough
CT: control target
= control target key end

     0   :  { %8 = vsyncpa [#allocation3], 0  ;;  %s1192_s0 = inlined_call_operand.hbm [shape: f32[176,192], index: 0, kind: input, shape index: {}]   ;;  %s1193_s1 = inlined_call_operand.vmem [shape: f32[192,32], index: 1, kind: input, shape index: {}]   ;;  %s1194_s2 = inlined_call_operand.vmem [shape: f32[1,32], index: 2, kind: input, shape index: {}]   ;;  %s1195_s3 = inlined_call_operand.vmem [shape: f32[176,32], index: 3, kind: output, shape index: {}]  }
   0x1   :  { %10 = vsyncpa [#allocation3 + $0x1], 0  ;;  %s904_s12 = smov 0   ;;  %s906_s13 = smov 0  }
   0x2   :  { %s908_s14 = smov 0   ;;  %s910_s15 = smov 0  }
   0x3 LB: > { %s923_s16 = sadd.s32 4294967295, %s846_s15   ;;  %s926_s17 = sadd.s32 1, %s846_s15   ;;  %s846_s15 = sphi %s910_s15, %s1204_s15   ;;  %s842_s14 = sphi %s908_s14, %s1203_s14   ;;  %s838_s13 = sphi %s906_s13, %s1202_s13   ;;  %s834_s12 = sphi %s904_s12, %s1201_s12  }
   0x4   : > { %s20_s18 = ssub.s32 %s846_s15, %s926_s17  ;;  %s23_s19 = sadd.s32 1, %s842_s14 }
   0x5   : > { %p21_p0 = scmp.eq.s32.totalorder %s20_s18, 0  ;;  %p30_p1 = scmp.ne.s32.totalorder %s842_s14, %s838_s13 }
   0x6   : > { %p31_p2 = scmp.eq.s32.totalorder %s846_s15, 0  ;;  %p36_p3 = scmp.ne.s32.totalorder %s838_s13, %s834_s12 }
   0x7   : > { %s936_s20 = scalar_select %p21_p0, %s842_s14, %s23_s19  }
   0x8   : > { %p32_p4 = por %p31_p2, %p30_p1  ;;  %p37_p5 = scmp.eq.s32.totalorder %s923_s16, 0 }
   0x9   : > { %p102_p6 = scmp.eq.s32.totalorder %s923_s16, 3  ;;  %p590_p9 = scmp.ge.s32.totalorder %s846_s15, 4 }
   0xa   : > { %p940_p7 = por %p37_p5, %p36_p3 }
   0xb   : > { %p944_p8 = por %p102_p6, %p30_p1  ;;  %130 = sbr.rel (%p590_p9) target bundleno = 53 (0x35), region = 24 }
  0x12   : > { %133 = sbr.rel (!%p32_p4) target bundleno = 53 (0x35), region = 28  ;;  %s134_s23 = sand.u32 (%p32_p4), 1, %s842_s14  }
  0x13   : > { %s139_s24 = smul.u32 (%p32_p4), 6, %s846_s15  ;;  %s954_s29 = scalar_lea.sflag (%p32_p4), [#allocation3], %s134_s23 }
  0x14   : > { %s644_s25 = smul.u32 (%p32_p4), 96, %s134_s23 }
  0x15   : > { %s140_s26 = ssub.s32 (%p32_p4), 22, %s139_s24 }
  0x16   : > { %p141_p10 = scmp.lt.s32.totalorder (%p32_p4), %s140_s26, 6  ;;  %s138_s30 = scalar_lea.vmem (%p32_p4), [#allocation2], %s644_s25 }
  0x19   : > { %s1206_s26 = smov (!%p141_p10, %s140_s26), 6 }
  0x1a   : > { %s951_s27 = sshll.u32 %s1206_s26, 8 }
  0x1b   : > { %s146_s28 = ssub.s32 1536, %s951_s27 }
  0x1c   : > { %147 = vsyncadd %s954_s29, %s146_s28  ;;  %p593_p11 = scmp.ne.s32.totalorder %s951_s27, 0  ;;  %s619_s4 = smul.u32 1536, %s846_s15 }
  0x1d   : > { %s153_s5 = sshll.u32 %s138_s30, 4  ;;  %s756_s12 = scalar_lea.hbm %s1192_s0, 5632  ;;  %s964_s5 = int_to_ptr.vmem [resolvable:$true] %s153_s5 }
  0x1e   : > { %s962_s8 = scalar_lea.hbm %s1192_s0, %s619_s4 }
  0x1f   : > { %s752_s9 = scalar_lea.hbm %s962_s8, %s951_s27  ;;  %p757_p1 = scmp.lt.u32.totalorder %s962_s8, %s1192_s0 }
  0x20   : > { %p753_p12 = scmp.ne.s32.totalorder %s962_s8, %s752_s9  ;;  %p758_p2 = scmp.lt.u32.totalorder %s756_s12, %s752_s9 }
  0x21   : > { %p760_p4 = scmp.lt.u32.totalorder %s752_s9, %s962_s8 }
  0x22   : > { %p754_p13 = pnand %p753_p12, %p593_p11  ;;  %p759_p3 = por %p758_p2, %p757_p1 }
  0x24   : > { %p755_p0 = pneg %p754_p13  ;;  %p761_p5 = por %p760_p4, %p759_p3 }
  0x26   : > { %p762_p6 = pnand %p761_p5, %p755_p0 }
  0x28   : > { %765 = shalt.err (!%p762_p6)
}
  0x29   : > { %s766_s23 = scalar_lea.vmem %s964_s5, %s951_s27  ;;  %s880_s24 = smov [#allocation2]  }
  0x2a   : > { %p767_p9 = scmp.ne.s32.totalorder %s964_s5, %s766_s23  ;;  %s770_s25 = sshll.u32 %s880_s24, 4  ;;  %s771_s25 = int_to_ptr.vmem [resolvable:$false] %s770_s25 }
  0x2b   : > { %s772_s26 = scalar_lea.vmem %s771_s25, 3072  ;;  %p773_p13 = scmp.lt.s32.totalorder %s964_s5, %s771_s25 }
  0x2c   : > { %p768_p10 = pnand %p767_p9, %p593_p11  ;;  %p774_p1 = scmp.lt.s32.totalorder %s772_s26, %s766_s23 }
  0x2e   : > { %p769_p12 = pneg %p768_p10  ;;  %p775_p2 = por %p774_p1, %p773_p13 }
  0x30   : > { %p776_p3 = pnand %p775_p2, %p769_p12 }
  0x32   : > { %779 = shalt.err (!%p776_p3)
}
  0x33   : > { %s881_s28 = smov 256   ;;  %s882_s30 = smov 16  }
  0x34   : > { %159 = dma.hbm_to_vmem [thread:$0]  (%p593_p11), %s962_s8, %s951_s27, %s964_s5, %s954_s29, %s881_s28, %s881_s28, %s882_s30  }
  0x35 PF: > { %p598_p0 = scmp.ge.s32.totalorder %s846_s15, 1  ;;  %p161_p4 = scmp.lt.s32.totalorder %s846_s15, 5 }
  0x37   : > { %p162_p5 = pnand %p598_p0, %p161_p4 }
  0x38   : > { %s994_s4 = sand.u32 (!%p162_p5), 1, %s838_s13  }
  0x39   : > { %165 = sbr.rel (%p162_p5) target bundleno = 401 (0x191), region = 32  ;;  %s168_s7 = scalar_lea.sflag (!%p162_p5), [#allocation3], %s994_s4 }
  0x3a   : > { %s645_s6 = smul.u32 (!%p162_p5), 96, %s994_s4 }
  0x3c   : > { %s998_s9 = scalar_lea.vmem (!%p162_p5), [#allocation2], %s645_s6 }
  0x40   : > { %829 = dma.done.wait (%p940_p7), %s168_s7, 1536  }
  0x41   : > { %831 = vsyncadd (%p940_p7), %s168_s7, 4294965760  ;;  %v883_v0 = vmov 0   ;;  %v223_v1 = vld [vmem:[%s1193_s1] sm:$0xff]  ;;  %v224_v2 = vld [vmem:[%s1193_s1 + $0x8] sm:$0xff]  ;;  %vm266_vm0 = vcmask 523264   ;;  %s646_s19 = smul.u32 48, %s994_s4 }
  0x42   : > { %620 = vmatprep.subr.bf16.mxu1 %v883_v0  ;;  %276 = vmatprep.subr.bf16.mxu0 %v883_v0  ;;  %v225_v3 = vld [vmem:[%s1193_s1 + $0x10] sm:$0xff]  ;;  %v247_v4 = vpack.c.bf16 %v224_v2, %v223_v1  ;;  %v226_v5 = vld [vmem:[%s1193_s1 + $0x18] sm:$0xff]  ;;  %v227_v7 = vld [vmem:[%s1193_s1 + $0x20] sm:$0xff]  ;;  %vm333_vm1 = vcmask 261120   ;;  %s347_s4 = smul.u32 (%p944_p8), 6, %s923_s16 }
  0x43   : > { %v248_v6 = vpack.c.bf16 %v226_v5, %v225_v3  ;;  %v228_v8 = vld [vmem:[%s1193_s1 + $0x28] sm:$0xff]  ;;  %v229_v10 = vld [vmem:[%s1193_s1 + $0x30] sm:$0xff]  ;;  %v230_v11 = vld [vmem:[%s1193_s1 + $0x38] sm:$0xff]  ;;  %s1119_s25 = scalar_lea.vmem [#allocation4], %s646_s19  }
  0x44   : > { %632 = vmatpush1.bf16.msra.mxu1 %v247_v4  ;;  %277 = vmatpush1.bf16.msra.mxu0 %v247_v4  ;;  %v249_v9 = vpack.c.bf16 %v228_v8, %v227_v7  ;;  %v210_v12 = vld [vmem:[%s998_s9 + $0x28] sm:$0xff]  ;;  %v212_v13 = vld [vmem:[%s998_s9 + $0x38] sm:$0xff]  ;;  %v250_v18 = vpack.c.bf16 %v230_v11, %v229_v10  ;;  %v231_v19 = vld [vmem:[%s1193_s1 + $0x40] sm:$0xff]  ;;  %s348_s26 = ssub.s32 (%p944_p8), 22, %s347_s4 }
  0x45   : > { %621 = vmatprep.subr.bf16.mxu1 %v883_v0  ;;  %278 = vmatprep.subr.bf16.mxu0 %v883_v0  ;;  %v220_v14 = vpack.c.bf16 %v212_v13, %v210_v12  ;;  %v206_v15 = vld [vmem:[%s998_s9 + $0x8] sm:$0xff]  ;;  %v208_v16 = vld [vmem:[%s998_s9 + $0x18] sm:$0xff]  ;;  %v233_v22 = vld [vmem:[%s1193_s1 + $0x50] sm:$0xff]  ;;  %p349_p7 = scmp.lt.s32.totalorder (%p944_p8), %s348_s26, 6 }
  0x46   : > { %v218_v17 = vpack.c.bf16 %v208_v16, %v206_v15  ;;  %v232_v20 = vld [vmem:[%s1193_s1 + $0x48] sm:$0xff]  ;;  %v234_v23 = vld [vmem:[%s1193_s1 + $0x58] sm:$0xff]  ;;  %v235_v25 = vld [vmem:[%s1193_s1 + $0x60] sm:$0xff] }
  0x47   : > { %601 = vmatprep.mubr.msk.bf16.mxu1 %vm266_vm0, %v220_v14  ;;  %v251_v21 = vpack.c.bf16 %v232_v20, %v231_v19  ;;  %v252_v24 = vpack.c.bf16 %v234_v23, %v233_v22  ;;  %v236_v26 = vld [vmem:[%s1193_s1 + $0x68] sm:$0xff]  ;;  %v237_v28 = vld [vmem:[%s1193_s1 + $0x70] sm:$0xff]  ;;  %v238_v29 = vld [vmem:[%s1193_s1 + $0x78] sm:$0xff] }
  0x48   : > { %633 = vmatpush1.bf16.msra.mxu1 %v248_v6  ;;  %279 = vmatpush1.bf16.msra.mxu0 %v248_v6  ;;  %v253_v27 = vpack.c.bf16 %v236_v26, %v235_v25  ;;  %v254_v30 = vpack.c.bf16 %v238_v29, %v237_v28  ;;  %v239_v31 = vld [vmem:[%s1193_s1 + $0x80] sm:$0xff]  ;;  %v240_v32 = vld [vmem:[%s1193_s1 + $0x88] sm:$0xff]  ;;  %v241_v34 = vld [vmem:[%s1193_s1 + $0x90] sm:$0xff] }
  0x49   : > { %622 = vmatprep.subr.bf16.mxu1 %v883_v0  ;;  %280 = vmatprep.subr.bf16.mxu0 %v883_v0  ;;  %v255_v33 = vpack.c.bf16 %v240_v32, %v239_v31  ;;  %v242_v35 = vld [vmem:[%s1193_s1 + $0x98] sm:$0xff]  ;;  %v243_v37 = vld [vmem:[%s1193_s1 + $0xa0] sm:$0xff]  ;;  %v244_v38 = vld [vmem:[%s1193_s1 + $0xa8] sm:$0xff] }
  0x4a   : > { %600 = vmatprep.mubr.msk.bf16.mxu0 %vm266_vm0, %v218_v17  ;;  %v256_v36 = vpack.c.bf16 %v242_v35, %v241_v34  ;;  %v257_v39 = vpack.c.bf16 %v244_v38, %v243_v37  ;;  %v245_v40 = vld [vmem:[%s1193_s1 + $0xb0] sm:$0xff]  ;;  %v246_v41 = vld [vmem:[%s1193_s1 + $0xb8] sm:$0xff]  ;;  %v209_v42 = vld [vmem:[%s998_s9 + $0x20] sm:$0xff] }
  0x4b   : > { %v258_v43 = vpack.c.bf16 %v246_v41, %v245_v40  ;;  %v211_v44 = vld [vmem:[%s998_s9 + $0x30] sm:$0xff]  ;;  %v205_v45 = vld [vmem:[%s998_s9] sm:$0xff]  ;;  %v214_v47 = vld [vmem:[%s998_s9 + $0x48] sm:$0xff] }
  0x4c   : > { %634 = vmatpush1.bf16.msra.mxu1 %v249_v9  ;;  %281 = vmatpush1.bf16.msra.mxu0 %v249_v9  ;;  %v207_v46 = vld [vmem:[%s998_s9 + $0x10] sm:$0xff]  ;;  %v216_v48 = vld [vmem:[%s998_s9 + $0x58] sm:$0xff]  ;;  %v219_v49 = vpack.c.bf16 %v211_v44, %v209_v42  ;;  %v213_v52 = vld [vmem:[%s998_s9 + $0x40] sm:$0xff] }
  0x4d   : > { %623 = vmatprep.subr.bf16.mxu1 %v883_v0  ;;  %282 = vmatprep.subr.bf16.mxu0 %v883_v0  ;;  %v217_v50 = vpack.c.bf16 %v207_v46, %v205_v45  ;;  %v222_v51 = vpack.c.bf16 %v216_v48, %v214_v47  ;;  %v215_v53 = vld [vmem:[%s998_s9 + $0x50] sm:$0xff]  ;;  %v599_v55 = vld [vmem:[%s1194_s2] ss:$0 sm:$0xff]  ;;  %s618_s9 = smul.u32 (%p944_p8), 48, %s923_s16 }
  0x4e   : > { %v221_v54 = vpack.c.bf16 %v215_v53, %v213_v52 }
  0x4f   : > { %s1140_s6 = scalar_lea.vmem (%p944_p8), %s1195_s3, %s618_s9  }
  0x50   : > { %635 = vmatpush1.bf16.msra.mxu1 %v250_v18  ;;  %283 = vmatpush1.bf16.msra.mxu0 %v250_v18 }
  0x51   : > { %624 = vmatprep.subr.bf16.mxu1 %v883_v0  ;;  %284 = vmatprep.subr.bf16.mxu0 %v883_v0 }
  0x54   : > { %636 = vmatpush1.bf16.msra.mxu1 %v251_v21  ;;  %285 = vmatpush1.bf16.msra.mxu0 %v251_v21 }
  0x55   : > { %625 = vmatprep.subr.bf16.mxu1 %v883_v0  ;;  %286 = vmatprep.subr.bf16.mxu0 %v883_v0 }
  0x58   : > { %637 = vmatpush1.bf16.msra.mxu1 %v252_v24  ;;  %287 = vmatpush1.bf16.msra.mxu0 %v252_v24 }
  0x59   : > { %626 = vmatprep.subr.bf16.mxu1 %v883_v0  ;;  %288 = vmatprep.subr.bf16.mxu0 %v883_v0 }
  0x5c   : > { %638 = vmatpush1.bf16.msra.mxu1 %v253_v27  ;;  %289 = vmatpush1.bf16.msra.mxu0 %v253_v27 }
  0x5d   : > { %627 = vmatprep.subr.bf16.mxu1 %v883_v0  ;;  %290 = vmatprep.subr.bf16.mxu0 %v883_v0 }
  0x60   : > { %639 = vmatpush1.bf16.msra.mxu1 %v254_v30  ;;  %291 = vmatpush1.bf16.msra.mxu0 %v254_v30 }
  0x61   : > { %628 = vmatprep.subr.bf16.mxu1 %v883_v0  ;;  %292 = vmatprep.subr.bf16.mxu0 %v883_v0 }
  0x64   : > { %640 = vmatpush1.bf16.msra.mxu1 %v255_v33  ;;  %293 = vmatpush1.bf16.msra.mxu0 %v255_v33 }
  0x65   : > { %629 = vmatprep.subr.bf16.mxu1 %v883_v0  ;;  %294 = vmatprep.subr.bf16.mxu0 %v883_v0 }
  0x68   : > { %641 = vmatpush1.bf16.msra.mxu1 %v256_v36  ;;  %295 = vmatpush1.bf16.msra.mxu0 %v256_v36 }
  0x69   : > { %630 = vmatprep.subr.bf16.mxu1 %v883_v0  ;;  %296 = vmatprep.subr.bf16.mxu0 %v883_v0 }
  0x6c   : > { %642 = vmatpush1.bf16.msra.mxu1 %v257_v39  ;;  %297 = vmatpush1.bf16.msra.mxu0 %v257_v39 }
  0x6d   : > { %631 = vmatprep.subr.bf16.mxu1 %v883_v0  ;;  %298 = vmatprep.subr.bf16.mxu0 %v883_v0 }
  0x70   : > { %643 = vmatpush1.bf16.msra.mxu1 %v258_v43  ;;  %299 = vmatpush1.bf16.msra.mxu0 %v258_v43 }
  0x73   : > { %317 = vmatmul.mubr.bf16.vlgmr.msra.gmra.mrb[0].mxu1 %v219_v49  ;;  %309 = vmatmul.mubr.bf16.vlgmr.msra.gmra.mrb[0].mxu0 %v217_v50 }
  0x74   : > { %602 = vmatprep.mubr.msk.bf16.mxu1 %vm266_vm0, %v222_v51 }
  0x7b   : > { %325 = vmatmul.mubr.bf16.gmra.mrb[4].mxu1 %v221_v54 }
 0x146   : > { %v318_v56 = vpop.f32.mrb[0].mxu1  ;;  %v310_v57 = vpop.f32.mrb[0].mxu0 }
 0x147   : > { %v319_v58 = vadd.f32 %v599_v55, %v318_v56  ;;  %v320_v59 = vpop.f32.mrb[1].mxu1  ;;  %v311_v60 = vadd.f32 %v599_v55, %v310_v57  ;;  %v312_v61 = vpop.f32.mrb[1].mxu0 }
 0x148   : > { %v321_v62 = vpop.f32.mrb[2].mxu1  ;;  %v313_v63 = vpop.f32.mrb[2].mxu0 }
 0x149   : > { %336 = vst.msk [vmem:[%s1119_s25 + $0x10] sm:$0xff] %vm333_vm1, %v319_v58  ;;  %v322_v0 = vadd.f32 %v599_v55, %v321_v62  ;;  %v323_v1 = vpop.f32.mrb[3].mxu1  ;;  %334 = vst.msk [vmem:[%s1119_s25] sm:$0xff] %vm333_vm1, %v311_v60  ;;  %v314_v2 = vadd.f32 %v599_v55, %v313_v63  ;;  %v315_v3 = vpop.f32.mrb[3].mxu0 }
 0x14b   : > { %337 = vst.msk [vmem:[%s1119_s25 + $0x18] sm:$0xff] %vm333_vm1, %v322_v0  ;;  %335 = vst.msk [vmem:[%s1119_s25 + $0x8] sm:$0xff] %vm333_vm1, %v314_v2 }
 0x14d   : > { %346 = sbr.rel (!%p944_p8) target bundleno = 401 (0x191), region = 40 }
 0x14e   : > { %v326_v4 = vpop.f32.mrb[4].mxu1 }
 0x14f   : > { %v327_v5 = vadd.f32 %v599_v55, %v326_v4  ;;  %v328_v6 = vpop.f32.mrb[5].mxu1 }
 0x150   : > { %v329_v7 = vpop.f32.mrb[6].mxu1 }
 0x151   : > { %338 = vst.msk [vmem:[%s1119_s25 + $0x20] sm:$0xff] %vm333_vm1, %v327_v5  ;;  %v330_v8 = vadd.f32 %v599_v55, %v329_v7  ;;  %v331_v9 = vpop.f32.mrb[7].mxu1 }
 0x153   : > { %339 = vst.msk [vmem:[%s1119_s25 + $0x28] sm:$0xff] %vm333_vm1, %v330_v8 }
 0x154   : > { %s1208_s26 = smov (!%p349_p7, %s348_s26), 6 }
 0x155   : > { %s603_s7 = sshll.u32 %s1208_s26, 7 }
 0x156   : > { %p606_p11 = scmp.eq.s32.totalorder %s603_s7, 0 }
 0x157   : > { %748 = sdivrem.u32 (!%p606_p11), %s1208_s26, 6 }
 0x158   : > { %357 = sbr.rel (%p606_p11) target bundleno = 401 (0x191), region = 44 }
 0x160   : > { %s1146_s22 = spop.drf %748 }
 0x161   : > { %p607_p8 = scmp.le.s32.totalorder %s1146_s22, 0 }
 0x162   : > { %s1198_s16 = smov (!%p607_p8), %s1140_s6  ;;  %s1199_s15 = smov (!%p607_p8), %s1119_s25 }
 0x163   : > { %541 = sbr.rel (%p607_p8) target bundleno = 372 (0x174), region = 126  ;;  %s1155_s27 = smov (!%p607_p8), 0  }
 0x164   : > { %s1157_s29 = smov (!%p607_p8), 0  }
 0x16a LB: >> { %v431_v10 = vld [vmem:[%s854_s15] sm:$0xff]  ;;  %v433_v11 = vld [vmem:[%s854_s15 + $0x8] sm:$0xff]  ;;  %v435_v12 = vld [vmem:[%s854_s15 + $0x10] sm:$0xff]  ;;  %s443_s5 = sadd.s32 1, %s858_s27  ;;  %s425_s29 = sadd.s32 1, %s862_s29   ;;  %s862_s29 = sphi %s1157_s29, %s425_s29   ;;  %s858_s27 = sphi %s1155_s27, %s1200_s27   ;;  %s854_s15 = sphi %s1199_s15, %s448_s15   ;;  %s850_s16 = sphi %s1198_s16, %s449_s16  }
 0x16b   : >> { %432 = vst [vmem:[%s850_s16] sm:$0xff] %v431_v10  ;;  %434 = vst [vmem:[%s850_s16 + $0x8] sm:$0xff] %v433_v11  ;;  %v437_v13 = vld [vmem:[%s854_s15 + $0x18] sm:$0xff]  ;;  %v439_v14 = vld [vmem:[%s854_s15 + $0x20] sm:$0xff]  ;;  %p444_p6 = scmp.ge.s32.totalorder %s443_s5, %s1146_s22  ;;  %p424_p9 = scmp.ge.s32.totalorder %s425_s29, %s1146_s22 }
 0x16c   : >> { %436 = vst [vmem:[%s850_s16 + $0x10] sm:$0xff] %v435_v12  ;;  %v441_v15 = vld [vmem:[%s854_s15 + $0x28] sm:$0xff]  ;;  %438 = vst [vmem:[%s850_s16 + $0x18] sm:$0xff] %v437_v13 }
 0x16d   : >> { %440 = vst [vmem:[%s850_s16 + $0x20] sm:$0xff] %v439_v14  ;;  %442 = vst [vmem:[%s850_s16 + $0x28] sm:$0xff] %v441_v15  ;;  %s1210_s5 = smov (%p444_p6, %s443_s5), 0  ;;  %427 = sbr.rel (!%p424_p9) target bundleno = 362 (0x16a), region = 132 }
 0x16e   : >> { %s446_s8 = smul.u32 48, %s1210_s5  ;;  %s1200_s27 = smov %s1210_s5 }
 0x170   : >> { %s448_s15 = scalar_lea.vmem %s1119_s25, %s446_s8 [#allocation4]   ;;  %s449_s16 = scalar_lea.vmem %s1140_s6, %s446_s8  }
 0x174 PF: > { %750 = sdivrem.u32 %s1208_s26, 6 }
 0x175   : > { %s608_s10 = smul.u32 48, %s1146_s22 }
 0x177   : > { %s454_s21 = scalar_lea.vmem %s1119_s25, %s608_s10 [#allocation4]   ;;  %s456_s11 = scalar_lea.vmem %s1140_s6, %s608_s10  }
 0x17d   : > { %s751_s12 = spop.drf %750 }
 0x17e   : > { %p610_p10 = scmp.le.s32.totalorder %s751_s12, 0 }
 0x17f   : > { %s864_s18 = smov (!%p610_p10), %s456_s11   ;;  %s868_s19 = smov (!%p610_p10), %s454_s21  }
 0x180   : > { %555 = sbr.rel (%p610_p10) target bundleno = 401 (0x191), region = 137  ;;  %s872_s23 = smov (!%p610_p10), 0  }
 0x181   : > { %s876_s24 = smov (!%p610_p10), 0  }
 0x187 LB: >> { %v466_v16 = vld [vmem:[%s870_s19] sm:$0xff]  ;;  %s468_s4 = sadd.s32 1, %s874_s23  ;;  %s460_s24 = sadd.s32 1, %s878_s24   ;;  %s878_s24 = sphi %s876_s24, %s460_s24   ;;  %s874_s23 = sphi %s872_s23, %s873_s23   ;;  %s870_s19 = sphi %s868_s19, %s473_s19   ;;  %s866_s18 = sphi %s864_s18, %s474_s18  }
 0x188   : >> { %467 = vst [vmem:[%s866_s18] sm:$0xff] %v466_v16  ;;  %p469_p12 = scmp.ge.s32.totalorder %s468_s4, %s751_s12  ;;  %p459_p13 = scmp.ge.s32.totalorder %s460_s24, %s751_s12 }
 0x18a   : >> { %s1212_s4 = smov (%p469_p12, %s468_s4), 0  ;;  %462 = sbr.rel (!%p459_p13) target bundleno = 391 (0x187), region = 143 }
 0x18b   : >> { %s611_s25 = sshll.u32 %s1212_s4, 3  ;;  %s873_s23 = smov %s1212_s4  }
 0x18c   : >> { %s473_s19 = scalar_lea.vmem %s454_s21, %s611_s25 [#allocation4]   ;;  %s474_s18 = scalar_lea.vmem %s456_s11, %s611_s25  }
 0x191 PF: > { %p13_p1 = scmp.ge.s32.totalorder %s926_s17, 6   ;;  %s1201_s12 = smov %s838_s13 }
 0x192   : > { %s1202_s13 = smov %s842_s14  ;;  %s1203_s14 = smov %s936_s20 }
 0x193   : > { %s1204_s15 = smov %s926_s17  ;;  %15 = sbr.rel (!%p13_p1) target bundleno = 3 (0x3), region = 154 }
 0x19a   :  { %490 = vsyncpa [#allocation3], 1 }
 0x19b   :  { %492 = vsyncpa [#allocation3 + $0x1], 1 }

</bundles_post_ra>
